<compile_context>
chip_gen: v5e
topology: v5e:2x2
jax: 0.10.0
libtpu: 0.0.40
codegen_flags: <defaults>
</compile_context>

<pallas_src>
import functools

import jax
import jax.numpy as jnp
from jax import lax
from jax.experimental import pallas as pl
from jax.experimental.pallas import tpu as pltpu


def _round_up(a, m):
    return (a + m - 1) // m * m


def _vmem_capacity_bytes():
    """Best-effort per-core VMEM capacity; conservative (v7x-sized) fallback."""
    try:
        info = pltpu.get_tpu_info()
        for attr in ("vmem_capacity_bytes", "vmem_bytes", "vmem_size_bytes",
                     "vmem_capacity", "vmem_size"):
            v = getattr(info, attr, None)
            if v:
                return int(v)
    except Exception:
        pass
    return 64 << 20


def attn_agg_kernel(x_ref, w_ref, b_ref, o_ref, m_ref, l_ref, acc_ref, *,
                    seq_len, block_seq, needs_seq_mask):
    # x_ref : (TB, TS, Fp) batch/sequence-blocked tile (VMEM)
    # w_ref : (1, Fp)      lane-dense attention weight row (VMEM)
    # b_ref : (1, 1)       attention bias scalar (SMEM)
    # o_ref : (TB, Fp)     output tile (resident across the sequence axis)
    # m/l/acc: online-softmax running max / denom / weighted sum (VMEM scratch)
    s = pl.program_id(1)

    @pl.when(s == 0)
    def _():
        m_ref[...] = jnp.full(m_ref.shape, -jnp.inf, dtype=m_ref.dtype)
        l_ref[...] = jnp.zeros(l_ref.shape, dtype=l_ref.dtype)
        acc_ref[...] = jnp.zeros(acc_ref.shape, dtype=acc_ref.dtype)

    xf = x_ref[...].astype(jnp.float32)           # (TB, TS, Fp); f32 math even for bf16 input
    wf = w_ref[...].astype(jnp.float32)           # (1, Fp)

    # Lane-dense (TB, TS) logits via VPU multiply + lane reduction (no MXU matvec,
    # no single-lane (TB, TS, 1) vregs).
    scores = jnp.sum(xf * wf, axis=-1) + b_ref[0, 0]            # (TB, TS)

    if needs_seq_mask:  # static: only when S was padded up to a multiple of TS
        pos = s * block_seq + lax.broadcasted_iota(jnp.int32, scores.shape, 1)
        scores = jnp.where(pos < seq_len, scores, -jnp.inf)

    # Online (streaming) softmax over sequence chunks.
    m_prev = m_ref[...]                                          # (TB, 1)
    m_new = jnp.maximum(m_prev, jnp.max(scores, axis=1, keepdims=True))
    alpha = jnp.exp(m_prev - m_new)                              # (TB, 1)
    p = jnp.exp(scores - m_new)                                  # (TB, TS), lane-dense exp
    l_ref[...] = alpha * l_ref[...] + jnp.sum(p, axis=1, keepdims=True)
    acc_ref[...] = alpha * acc_ref[...] + jnp.sum(p[:, :, None] * xf, axis=1)
    m_ref[...] = m_new
    # TODO(synk): if profiling shows the VALU slot binding (e.g. v7x with bf16 input),
    # move the weighted sum to the MXU via einsum('bs,bsf->bf', ...) instead.

    @pl.when(s == pl.num_programs(1) - 1)
    def _():
        inv = pl.reciprocal(l_ref[...], approx=False)            # (TB, 1); approx=True if
        o_ref[...] = (acc_ref[...] * inv).astype(o_ref.dtype)    # looser tolerance is OK

    # TODO(synk): dropout_1 / dropout_2 are identity in eval mode; training-mode dropout
    # would need pltpu.prng_seed + pltpu.stateful_bernoulli masks.


def attention_aggregating_head(x, w, b, *, block_batch=None, block_seq=None,
                               vmem_limit_bytes=None):
    """x: (B, S, F), w: (1, F) (nn.Linear (out,in) layout), b: (1, 1) -> (B, F).

    The wrapped `model` is treated as an identity feature extractor: x already has
    the (batch, seq_len, feature_len) layout the PyTorch head expects.  x may be
    bf16 (half the HBM input bytes); all softmax/accumulation math runs in f32.
    """
    B, S, F = x.shape
    itemsize = jnp.dtype(x.dtype).itemsize

    # ---- lane-dense feature axis: pad F to a multiple of 128 (exact for this op).
    Fp = _round_up(max(F, 1), 128)
    if Fp != F:
        x = jnp.pad(x, ((0, 0), (0, 0), (0, Fp - F)))
        w = jnp.pad(w, ((0, 0), (0, Fp - F)))

    # ---- per-generation targets ------------------------------------------------
    vmem_cap = _vmem_capacity_bytes()
    if vmem_cap >= (100 << 20):            # v5e / v6e: 128 MiB VMEM
        target_bytes = 8 << 20
        vmem_cap_limit = 96 << 20
    else:                                  # v7x: 64 MiB VMEM per TensorCore
        target_bytes = 4 << 20
        vmem_cap_limit = 52 << 20

    # ---- choose the (TB, TS) tile ------------------------------------------------
    row_bytes = S * Fp * itemsize
    if block_seq is not None:
        TS = int(block_seq)
    elif 8 * row_bytes <= target_bytes or B * row_bytes <= target_bytes:
        TS = S                              # whole sequence fits comfortably
    else:
        TS = target_bytes // (8 * Fp * itemsize)
    if TS >= S:
        TS = S                              # single chunk (no masking needed)
    else:
        TS = max(8, (TS // 8) * 8)          # chunked: sublane-aligned

    if block_batch is not None:
        tb = int(block_batch)
    else:
        tb = target_bytes // (TS * Fp * itemsize)
    tb = max(1, min(tb, B))
    if tb >= 8:
        tb = (tb // 8) * 8                  # round DOWN only (no 8x bump for huge rows)
    elif tb < B:
        tb = min(B, 8)                      # keep batch blocks sublane-aligned

    # v7x has two TensorCores: when one block would cover the whole batch but half
    # of it is still a multi-MiB tile, split so the "parallel" axis has >= 2 steps.
    if block_batch is None and tb >= B and B >= 16:
        half = (((B + 1) // 2) // 8) * 8
        if half >= 8 and half * TS * Fp * itemsize >= (2 << 20):
            tb = half

    TB, TS = int(tb), int(TS)
    Bp = _round_up(B, TB)
    Sp = _round_up(S, TS)
    needs_seq_mask = Sp != S
    if Bp != B or Sp != S:
        # Zero padding: padded batch rows produce garbage rows that are sliced off;
        # padded sequence rows are masked to -inf logits inside the kernel.
        x = jnp.pad(x, ((0, Bp - B), (0, Sp - S), (0, 0)))

    # ---- temp-aware VMEM budget ---------------------------------------------------
    if vmem_limit_bytes is None:
        blk_in = TB * TS * Fp * itemsize    # one x tile (input dtype)
        f32_tile = TB * TS * Fp * 4         # f32 upcast / xf*wf / p*xf temporaries
        out_row = TB * Fp * 4
        need = (2 * blk_in                  # double-buffered x tile
                + 3 * f32_tile              # whole-tile f32 temporaries
                + 3 * out_row               # acc scratch + double-buffered output
                + 2 * Fp * 4                # weight row
                + (1 << 20))                # slack (m/l scratch, internal)
        vmem_limit_bytes = int(min(max(int(need * 1.25), 32 << 20), vmem_cap_limit))

    kernel = functools.partial(attn_agg_kernel, seq_len=S, block_seq=TS,
                               needs_seq_mask=needs_seq_mask)

    out = pl.pallas_call(
        kernel,
        out_shape=jax.ShapeDtypeStruct((Bp, Fp), x.dtype),
        grid_spec=pltpu.PrefetchScalarGridSpec(
            num_scalar_prefetch=0,
            grid=(Bp // TB, Sp // TS),
            in_specs=[
                pl.BlockSpec((TB, TS, Fp), lambda i, s: (i, s, 0)),   # x tile
                pl.BlockSpec((1, Fp), lambda i, s: (0, 0)),           # lane-dense weight row
                pl.BlockSpec(memory_space=pltpu.MemorySpace.SMEM),    # bias scalar
            ],
            out_specs=pl.BlockSpec((TB, Fp), lambda i, s: (i, 0)),    # resident across seq axis
            scratch_shapes=[
                pltpu.VMEM((TB, 1), jnp.float32),    # running max m
                pltpu.VMEM((TB, 1), jnp.float32),    # running denom l
                pltpu.VMEM((TB, Fp), jnp.float32),   # running weighted sum acc
            ],
        ),
        compiler_params=pltpu.CompilerParams(
            dimension_semantics=("parallel", "arbitrary"),
            vmem_limit_bytes=vmem_limit_bytes,
        ),
        # NOTE: if DMA bubbles remain after tile-size tuning, pipeline_mode=pl.Buffered(3)
        # on the x BlockSpec is the next (minor) lever.
    )(x, w, b)
    return out[:B, :F]


def reference(x, w, b):
    scores = jnp.einsum("bsf,of->bso", x, w) + b[0, 0]    # (B, S, 1)
    attn = jax.nn.softmax(scores, axis=1)                 # (B, S, 1)
    return jnp.sum(attn * x, axis=1)                      # (B, F)


if __name__ == "__main__":
    key = jax.random.PRNGKey(0)
    kx, kw, kb, kx2, kx3 = jax.random.split(key, 5)

    B, S, F = 2, 8, 32   # batch x seq_len x feature_len

    # Deterministic nn.Linear(F, 1)-style init: U(-1/sqrt(F), 1/sqrt(F)),
    # weight kept in the PyTorch (out_features, in_features) = (1, F) layout.
    bound = 1.0 / jnp.sqrt(jnp.float32(F))
    w = jax.random.uniform(kw, (1, F), jnp.float32, -bound, bound)
    b = jax.random.uniform(kb, (1, 1), jnp.float32, -bound, bound)

    # 1) Base shape: whole sequence in a single chunk.
    x = jax.random.normal(kx, (B, S, F), dtype=jnp.float32)
    out = jax.block_until_ready(attention_aggregating_head(x, w, b))
    ref = reference(x, w, b)
    assert out.shape == (B, F)
    assert jnp.allclose(out, ref, atol=1e-5, rtol=1e-5), "f32 single-chunk mismatch"

    # 2) Online-softmax path: sequence chunking with tail masking (S=20, TS=8).
    B2, S2 = 4, 20
    x2 = jax.random.normal(kx2, (B2, S2, F), dtype=jnp.float32)
    out2 = jax.block_until_ready(
        attention_aggregating_head(x2, w, b, block_batch=4, block_seq=8))
    ref2 = reference(x2, w, b)
    assert jnp.allclose(out2, ref2, atol=1e-5, rtol=1e-5), "chunked-softmax mismatch"

    # 3) bf16 streaming contract: half the HBM input bytes, f32 math in-kernel.
    x3 = jax.random.normal(kx3, (B2, S2, F), dtype=jnp.float32).astype(jnp.bfloat16)
    out3 = jax.block_until_ready(attention_aggregating_head(x3, w, b))
    ref3 = reference(x3.astype(jnp.float32), w, b)
    assert jnp.allclose(out3.astype(jnp.float32), ref3, atol=2e-2, rtol=2e-2), \
        "bf16-streaming mismatch"

    print("KERNEL_OK")
</pallas_src>

<mosaic_0001>
module attributes {stable_mosaic.version = 11 : i64} {
  func.func @attn_agg_kernel(%arg0: i32, %arg1: i32, %arg2: memref<2x8x128xf32, #tpu.memory_space<vmem>>, %arg3: memref<1x128xf32, #tpu.memory_space<vmem>>, %arg4: memref<1x1xf32, #tpu.memory_space<smem>>, %arg5: memref<2x128xf32, #tpu.memory_space<vmem>>, %arg6: memref<2x1xf32, #tpu.memory_space<vmem>>, %arg7: memref<2x1xf32, #tpu.memory_space<vmem>>, %arg8: memref<2x128xf32, #tpu.memory_space<vmem>>) attributes {dimension_semantics = [#tpu.dimension_semantics<parallel>, #tpu.dimension_semantics<arbitrary>], iteration_bounds = array<i64: 1, 1>, scalar_prefetch = 0 : i64, scratch_operands = 3 : i64, tpu.core_type = #tpu.core_type<tc>, window_params = [{transform_indices = @transform_0, window_bounds = array<i64: 2, 8, 128>}, {pipeline_mode = #tpu.pipeline_mode<synchronous>, transform_indices = @transform_1, window_bounds = array<i64: 1, 128>}, {transform_indices = @transform_2, window_bounds = array<i64: 1, 1>}, {transform_indices = @transform_3, window_bounds = array<i64: 2, 128>}]} {
    %c0_i32 = arith.constant 0 : i32
    %0 = arith.cmpi eq, %arg1, %c0_i32 : i32
    %1 = arith.extui %0 : i1 to i32
    %c0_i32_0 = arith.constant 0 : i32
    %2 = arith.cmpi ne, %1, %c0_i32_0 : i32
    scf.if %2 {
      %cst_24 = arith.constant 0xFF800000 : f32
      %40 = vector.broadcast %cst_24 : f32 to vector<2x1xf32>
      %c0_25 = arith.constant 0 : index
      %c0_26 = arith.constant 0 : index
      %41 = vector.load %arg6[%c0_25, %c0_26] : memref<2x1xf32, #tpu.memory_space<vmem>>, vector<2x1xf32>
      tpu.vector_store %arg6[%c0_25, %c0_26], %40 {strides = array<i32>} : memref<2x1xf32, #tpu.memory_space<vmem>>, vector<2x1xf32>,
      %cst_27 = arith.constant 0.000000e+00 : f32
      %42 = vector.broadcast %cst_27 : f32 to vector<2x1xf32>
      %c0_28 = arith.constant 0 : index
      %c0_29 = arith.constant 0 : index
      %43 = vector.load %arg7[%c0_28, %c0_29] : memref<2x1xf32, #tpu.memory_space<vmem>>, vector<2x1xf32>
      tpu.vector_store %arg7[%c0_28, %c0_29], %42 {strides = array<i32>} : memref<2x1xf32, #tpu.memory_space<vmem>>, vector<2x1xf32>,
      %cst_30 = arith.constant 0.000000e+00 : f32
      %44 = vector.broadcast %cst_30 : f32 to vector<2x128xf32>
      %c0_31 = arith.constant 0 : index
      %c0_32 = arith.constant 0 : index
      %45 = vector.load %arg8[%c0_31, %c0_32] : memref<2x128xf32, #tpu.memory_space<vmem>>, vector<2x128xf32>
      tpu.vector_store %arg8[%c0_31, %c0_32], %44 {strides = array<i32>} : memref<2x128xf32, #tpu.memory_space<vmem>>, vector<2x128xf32>,
    } else {
    }
    %c0 = arith.constant 0 : index
    %c0_1 = arith.constant 0 : index
    %c0_2 = arith.constant 0 : index
    %3 = vector.load %arg2[%c0, %c0_1, %c0_2] : memref<2x8x128xf32, #tpu.memory_space<vmem>>, vector<2x8x128xf32>
    %c0_3 = arith.constant 0 : index
    %c0_4 = arith.constant 0 : index
    %4 = vector.load %arg3[%c0_3, %c0_4] : memref<1x128xf32, #tpu.memory_space<vmem>>, vector<1x128xf32>
    %5 = vector.shape_cast %4 : vector<1x128xf32> to vector<1x1x128xf32>
    %6 = vector.broadcast %5 : vector<1x1x128xf32> to vector<2x8x128xf32>
    %7 = arith.mulf %3, %6 : vector<2x8x128xf32>
    %cst = arith.constant dense<0.000000e+00> : vector<2x8xf32>
    %8 = vector.multi_reduction <add>, %7, %cst [2] : vector<2x8x128xf32> to vector<2x8xf32>
    %c0_5 = arith.constant 0 : index
    %c0_6 = arith.constant 0 : index
    %9 = memref.load %arg4[%c0_5, %c0_6] : memref<1x1xf32, #tpu.memory_space<smem>>
    %10 = vector.broadcast %9 : f32 to vector<2x8xf32>
    %11 = arith.addf %8, %10 : vector<2x8xf32>
    %c0_7 = arith.constant 0 : index
    %c0_8 = arith.constant 0 : index
    %12 = vector.load %arg6[%c0_7, %c0_8] : memref<2x1xf32, #tpu.memory_space<vmem>>, vector<2x1xf32>
    %cst_9 = arith.constant dense<0xFF800000> : vector<2xf32>
    %13 = vector.multi_reduction <maximumf>, %11, %cst_9 [1] : vector<2x8xf32> to vector<2xf32>
    %14 = vector.shape_cast %13 : vector<2xf32> to vector<2x1xf32>
    %15 = arith.maximumf %12, %14 : vector<2x1xf32>
    %16 = arith.subf %12, %15 : vector<2x1xf32>
    %17 = math.exp %16 : vector<2x1xf32>
    %18 = vector.broadcast %15 : vector<2x1xf32> to vector<2x8xf32>
    %19 = arith.subf %11, %18 : vector<2x8xf32>
    %20 = math.exp %19 : vector<2x8xf32>
    %c0_10 = arith.constant 0 : index
    %c0_11 = arith.constant 0 : index
    %21 = vector.load %arg7[%c0_10, %c0_11] : memref<2x1xf32, #tpu.memory_space<vmem>>, vector<2x1xf32>
    %22 = arith.mulf %17, %21 : vector<2x1xf32>
    %cst_12 = arith.constant dense<0.000000e+00> : vector<2xf32>
    %23 = vector.multi_reduction <add>, %20, %cst_12 [1] : vector<2x8xf32> to vector<2xf32>
    %24 = vector.shape_cast %23 : vector<2xf32> to vector<2x1xf32>
    %25 = arith.addf %22, %24 : vector<2x1xf32>
    %c0_13 = arith.constant 0 : index
    %c0_14 = arith.constant 0 : index
    %26 = vector.load %arg7[%c0_13, %c0_14] : memref<2x1xf32, #tpu.memory_space<vmem>>, vector<2x1xf32>
    tpu.vector_store %arg7[%c0_13, %c0_14], %25 {strides = array<i32>} : memref<2x1xf32, #tpu.memory_space<vmem>>, vector<2x1xf32>,
    %c0_15 = arith.constant 0 : index
    %c0_16 = arith.constant 0 : index
    %27 = vector.load %arg8[%c0_15, %c0_16] : memref<2x128xf32, #tpu.memory_space<vmem>>, vector<2x128xf32>
    %28 = vector.broadcast %17 : vector<2x1xf32> to vector<2x128xf32>
    %29 = arith.mulf %28, %27 : vector<2x128xf32>
    %30 = vector.shape_cast %20 : vector<2x8xf32> to vector<2x8x1xf32>
    %31 = vector.broadcast %30 : vector<2x8x1xf32> to vector<2x8x128xf32>
    %32 = arith.mulf %31, %3 : vector<2x8x128xf32>
    %cst_17 = arith.constant dense<0.000000e+00> : vector<2x128xf32>
    %33 = vector.multi_reduction <add>, %32, %cst_17 [1] : vector<2x8x128xf32> to vector<2x128xf32>
    %34 = arith.addf %29, %33 : vector<2x128xf32>
    %c0_18 = arith.constant 0 : index
    %c0_19 = arith.constant 0 : index
    %35 = vector.load %arg8[%c0_18, %c0_19] : memref<2x128xf32, #tpu.memory_space<vmem>>, vector<2x128xf32>
    tpu.vector_store %arg8[%c0_18, %c0_19], %34 {strides = array<i32>} : memref<2x128xf32, #tpu.memory_space<vmem>>, vector<2x128xf32>,
    %c0_20 = arith.constant 0 : index
    %c0_21 = arith.constant 0 : index
    %36 = vector.load %arg6[%c0_20, %c0_21] : memref<2x1xf32, #tpu.memory_space<vmem>>, vector<2x1xf32>
    tpu.vector_store %arg6[%c0_20, %c0_21], %15 {strides = array<i32>} : memref<2x1xf32, #tpu.memory_space<vmem>>, vector<2x1xf32>,
    %c0_i32_22 = arith.constant 0 : i32
    %37 = arith.cmpi eq, %arg1, %c0_i32_22 : i32
    %38 = arith.extui %37 : i1 to i32
    %c0_i32_23 = arith.constant 0 : i32
    %39 = arith.cmpi ne, %38, %c0_i32_23 : i32
    scf.if %39 {
      %c0_24 = arith.constant 0 : index
      %c0_25 = arith.constant 0 : index
      %40 = vector.load %arg7[%c0_24, %c0_25] : memref<2x1xf32, #tpu.memory_space<vmem>>, vector<2x1xf32>
      %41 = tpu.reciprocal %40 : vector<2x1xf32> -> vector<2x1xf32>
      %c0_26 = arith.constant 0 : index
      %c0_27 = arith.constant 0 : index
      %42 = vector.load %arg8[%c0_26, %c0_27] : memref<2x128xf32, #tpu.memory_space<vmem>>, vector<2x128xf32>
      %43 = vector.broadcast %41 : vector<2x1xf32> to vector<2x128xf32>
      %44 = arith.mulf %42, %43 : vector<2x128xf32>
      %c0_28 = arith.constant 0 : index
      %c0_29 = arith.constant 0 : index
      %45 = vector.load %arg5[%c0_28, %c0_29] : memref<2x128xf32, #tpu.memory_space<vmem>>, vector<2x128xf32>
      tpu.vector_store %arg5[%c0_28, %c0_29], %44 {strides = array<i32>} : memref<2x128xf32, #tpu.memory_space<vmem>>, vector<2x128xf32>,
    } else {
    }
    return
  }
  func.func @transform_0(%arg0: i32, %arg1: i32) -> (i32, i32, i32) {
    %c0_i32 = arith.constant 0 : i32
    %c0_i32_0 = arith.constant 0 : i32
    return %arg0, %arg1, %c0_i32 : i32, i32, i32
  }
  func.func @transform_1(%arg0: i32, %arg1: i32) -> (i32, i32) {
    %c0_i32 = arith.constant 0 : i32
    %c0_i32_0 = arith.constant 0 : i32
    %c0_i32_1 = arith.constant 0 : i32
    return %c0_i32, %c0_i32_0 : i32, i32
  }
  func.func @transform_2(%arg0: i32, %arg1: i32) -> (i32, i32) {
    %c0_i32 = arith.constant 0 : i32
    %c0_i32_0 = arith.constant 0 : i32
    %c0_i32_1 = arith.constant 0 : i32
    return %c0_i32, %c0_i32_0 : i32, i32
  }
  func.func @transform_3(%arg0: i32, %arg1: i32) -> (i32, i32) {
    %c0_i32 = arith.constant 0 : i32
    %c0_i32_0 = arith.constant 0 : i32
    return %arg0, %c0_i32 : i32, i32
  }
}

</mosaic_0001>

<bundles_post_ra>
// kernel: tpu_custom_call.1
= control target key start
LH: loop header
LB: loop body
LE: loop exit
PB: predicated region body
PF: predicated region fallthrough
CT: control target
= control target key end

     0   :  { %9 = vsyncpa [#allocation7], 0  ;;  %s300_s0 = inlined_call_operand.hbm [shape: f32[2,8,128], index: 0, kind: input, shape index: {}]   ;;  %s301_s1 = inlined_call_operand.vmem [shape: f32[1,128], index: 1, kind: input, shape index: {}]   ;;  %s302_s2 = inlined_call_operand.<no memory space> [shape: f32[1,1], index: 2, kind: input, shape index: {}]   ;;  %s303_s3 = inlined_call_operand.hbm [shape: f32[2,128], index: 3, kind: output, shape index: {}]  }
   0x1   :  { %10 = vsyncpa [#allocation8], 0  ;;  %s15_s14 = sshll.u32 %s300_s0, 4  ;;  %s252_s15 = smov [#allocation6]   ;;  %s16_s14 = int_to_ptr.hbm [resolvable:$true] %s15_s14 }
   0x2   :  { %s17_s16 = sshll.u32 %s252_s15, 4  ;;  %s253_s17 = smov 128   ;;  %s18_s16 = int_to_ptr.vmem [resolvable:$true] %s17_s16 }
   0x3   :  { %s254_s18 = smov 8  }
   0x4   :  { %23 = dma.hbm_to_vmem [thread:$0]  %s16_s14, 256, %s18_s16, [#allocation7], %s253_s17, %s253_s17, %s254_s18  }
   0x5   :  { %248 = dma.done.wait [#allocation7], 256  }
   0x6   :  { %249 = vsyncadd [#allocation7], 4294967040  ;;  %v40_v0 = vld [vmem:[#allocation6] sm:$0xff]  ;;  %v191_v1 = vld [vmem:[%s301_s1] ss:$0 sm:$0xff]  ;;  %vm36_vm0 = vcmask 1024   ;;  %v59_v7 = vlaneseq  ;;  %v53_v8 = vstv %s302_s2 }
   0x7   :  { %v46_v2 = vmul.f32 %v191_v1, %v40_v0  ;;  %v41_v3 = vld [vmem:[#allocation6 + $0x8] sm:$0xff]  ;;  %v255_v5 = vmov -inf   ;;  %vm63_vm1 = vcmask 1041409   ;;  %vm66_vm2 = vcmask 58368   ;;  %s258_s1 = smov [#allocation9]   ;;  %s171_s24 = sshll.u32 %s303_s3, 4  ;;  %s172_s24 = int_to_ptr.hbm [resolvable:$true] %s171_s24 }
   0x8   :  { %v47_v4 = vmul.f32 %v191_v1, %v41_v3  ;;  %37 = vst.msk [vmem:[#allocation2] sm:$0x3] %vm36_vm0, %v255_v5  ;;  %v60_v9 = vand.u32 127, %v59_v7  ;;  %v256_v17 = vmov 0   ;;  %v257_v18 = vmov 0.0   ;;  %s169_s2 = sshll.u32 %s258_s1, 4  ;;  %s170_s2 = int_to_ptr.vmem [resolvable:$true] %s169_s2 }
   0x9   :  { %48 = vadd.xlane.f32.xlu0 %v46_v2  ;;  %188 = vset.pattern.permute.xlu1 %v256_v17  ;;  %38 = vst.msk [vmem:[#allocation3] sm:$0x3] %vm36_vm0, %v257_v18 }
   0xa   :  { %189 = vset.pattern.permute.xlu2 %v256_v17  ;;  %190 = vset.pattern.permute.xlu0 %v256_v17  ;;  %39 = vst [vmem:[#allocation4] sm:$0x3] %v257_v18 }
   0xf   :  { %v56_v19 = vld [vmem:[#allocation2] sm:$0x3] }
  0x10   :  { %v88_v59 = vld [vmem:[#allocation3] sm:$0x3] }
  0x11   :  { %50 = vadd.xlane.f32.xlu0 %v47_v4  ;;  %v108_v52 = vld [vmem:[#allocation4] sm:$0x3] }
  0x7c   :  { %v49_v6 = vpop.xlane.xlu0 %48 }
  0x7d   :  { %v54_v10 = vadd.f32 %v53_v8, %v49_v6 }
  0x7f   :  { %v61_v13 = vperm.slane %v54_v10, %v60_v9 }
  0x84   :  { %v51_v11 = vpop.xlane.xlu0 %50 }
  0x85   :  { %v55_v12 = vadd.f32 %v53_v8, %v51_v11 }
  0x87   :  { %v62_v14 = vperm.slane %v55_v12, %v60_v9 }
  0x89   :  { %v64_v15 = vsel %vm63_vm1, %v62_v14, %v61_v13 }
  0x8a   :  { %v67_v16 = vsel %vm66_vm2, %v64_v15, -inf }
  0x8b   :  { %68 = vmax.xlane.f32.xlu1 %v67_v16 }
  0xfe   :  { %v69_v20 = vpop.xlane.xlu1 %68 }
  0xff   :  { %v70_v21 = vmax.f32 %v56_v19, %v69_v20 }
 0x101   :  { %v71_v22 = vsub.f32 %v56_v19, %v70_v21  ;;  %137 = vst.msk [vmem:[#allocation2] sm:$0x3] %vm36_vm0, %v70_v21  ;;  %76 = vperm.xlu1 %188, %v70_v21  }
 0x103   :  { %v72_v31 = vmul.f32 1.442695, %v71_v22 }
 0x173   :  { %v77_v23 = vpop.permute.xlu1 %76 }
 0x174   :  { %v78_v24 = vperm.slane %v77_v23, 0  ;;  %v79_v25 = vperm.slane %v77_v23, 1 }
 0x176   :  { %v82_v26 = vsub.f32 %v54_v10, %v78_v24  ;;  %v83_v28 = vsub.f32 %v55_v12, %v79_v25 }
 0x178   :  { %v84_v27 = vmul.f32 1.442695, %v82_v26  ;;  %v86_v29 = vmul.f32 1.442695, %v83_v28 }
 0x17a   :  { %192 = vpow2.f32 %v84_v27 }
 0x17b   :  { %194 = vpow2.f32 %v86_v29 }
 0x17c   :  { %196 = vpow2.f32 %v72_v31 }
 0x180   :  { %v193_v30 = vpop.eup %192 }
 0x181   :  { %93 = vperm.xlu2 %189, %v193_v30   ;;  %v195_v32 = vpop.eup %194 }
 0x182   :  { %v197_v33 = vpop.eup %196 }
 0x183   :  { %v89_v60 = vmul.f32 %v197_v33, %v88_v59 }
 0x189   :  { %96 = vperm.xlu2 %189, %v195_v32  }
 0x191   :  { %111 = vperm.xlu2 %189, %v197_v33  }
 0x1db   :  { %v94_v34 = vpop.permute.xlu2 %93 }
 0x1dc   :  { %v117_v35 = vmul.f32 %v94_v34, %v40_v0  ;;  %v98_v39 = vperm.slane %v94_v34, %v60_v9 }
 0x1de   :  { %v119_v36 = vrot.slane %v117_v35, 4 }
 0x1e0   :  { %v120_v37 = vadd.f32 %v119_v36, %v117_v35 }
 0x1e2   :  { %v121_v40 = vrot.slane %v120_v37, 2 }
 0x1e3   :  { %v97_v38 = vpop.permute.xlu2 %96 }
 0x1e4   :  { %v99_v41 = vperm.slane %v97_v38, %v60_v9  ;;  %v118_v42 = vmul.f32 %v97_v38, %v41_v3  ;;  %v122_v46 = vadd.f32 %v121_v40, %v120_v37 }
 0x1e6   :  { %v125_v43 = vrot.slane %v118_v42, 4  ;;  %v100_v44 = vsel %vm63_vm1, %v99_v41, %v98_v39  ;;  %v123_v49 = vrot.slane %v122_v46, 1 }
 0x1e7   :  { %v102_v45 = vsel %vm66_vm2, %v100_v44, 0.0 }
 0x1e8   :  { %v126_v47 = vadd.f32 %v125_v43, %v118_v42  ;;  %103 = vadd.xlane.f32.xlu0 %v102_v45  ;;  %v124_v54 = vadd.f32 %v123_v49, %v122_v46 }
 0x1ea   :  { %v127_v48 = vrot.slane %v126_v47, 2 }
 0x1eb   :  { %v112_v53 = vpop.permute.xlu2 %111 }
 0x1ec   :  { %v128_v50 = vadd.f32 %v127_v48, %v126_v47  ;;  %v114_v56 = vmul.f32 %v112_v53, %v108_v52 }
 0x1ee   :  { %v129_v51 = vrot.slane %v128_v50, 1 }
 0x1f0   :  { %v130_v55 = vadd.f32 %v129_v51, %v128_v50 }
 0x1f2   :  { %v133_v57 = vsel %vm63_vm1, %v130_v55, %v124_v54 }
 0x1f3   :  { %v135_v58 = vadd.f32 %v133_v57, %v114_v56 }
 0x1f5   :  { %136 = vst [vmem:[#allocation4] sm:$0x3] %v135_v58 }
 0x1fc   :  { %v156_v10 = vld [vmem:[#allocation4] sm:$0x3] }
 0x25b   :  { %v104_v61 = vpop.xlane.xlu0 %103 }
 0x25c   :  { %v105_v62 = vadd.f32 %v104_v61, %v89_v60 }
 0x25e   :  { %107 = vst.msk [vmem:[#allocation3] sm:$0x3] %vm36_vm0, %v105_v62 }
 0x265   :  { %v141_v63 = vld [vmem:[#allocation3] sm:$0x3] }
 0x266   :  { %198 = vrcp.f32 %v141_v63  ;;  %v153_v3 = vand.u32 2147483648, %v141_v63  ;;  %v151_v5 = vand.u32 2147483647, %v141_v63  ;;  %vm147_vm4 = vweird.f32 %v141_v63 }
 0x268   :  { %v154_v7 = vor.u32 1.1754944e-38, %v153_v3  ;;  %vm152_vm6 = vcmp.eq.f32.partialorder %v151_v5, 8.507059e+37 }
 0x26c   :  { %v199_v0 = vpop.eup %198 }
 0x26d   :  { %v143_v1 = vmul.f32 %v199_v0, %v141_v63  ;;  %vm148_vm3 = vweird.f32 %v199_v0 }
 0x26e   :  { %vm149_vm5 = vmor %vm147_vm4, %vm148_vm3 }
 0x26f   :  { %v144_v2 = vsub.f32 1.0, %v143_v1 }
 0x271   :  { %v145_v4 = vmul.f32 %v199_v0, %v144_v2 }
 0x273   :  { %v146_v6 = vadd.f32 %v199_v0, %v145_v4 }
 0x275   :  { %v150_v8 = vsel %vm149_vm5, %v199_v0, %v146_v6 }
 0x276   :  { %v155_v9 = vsel %vm152_vm6, %v154_v7, %v150_v8 }
 0x277   :  { %159 = vperm.xlu0 %190, %v155_v9  }
 0x2e9   :  { %v160_v11 = vpop.permute.xlu0 %159 }
 0x2ea   :  { %v162_v12 = vmul.f32 %v160_v11, %v156_v10 }
 0x2ec   :  { %163 = vst [vmem:[#allocation9] sm:$0x3] %v162_v12 }
 0x2ed   :  { %174 = dma.vmem_to_hbm [thread:$0]  %s170_s2, 32, %s172_s24, [#allocation8]  }
 0x2ee   :  { %250 = dma.done.wait [#allocation8], 32  }
 0x2ef   :  { %251 = vsyncadd [#allocation8], 4294967264 }
 0x2f0   :  { %179 = vsyncpa [#allocation7], 1 }
 0x2f1   :  { %180 = vsyncpa [#allocation8], 1 }

</bundles_post_ra>
